<compile_context>
chip_gen: v6e
topology: v6e:2x2x1
jax: 0.10.0
libtpu: 0.0.40
codegen_flags: <defaults>
</compile_context>

<pallas_src>
import functools

import jax
import jax.numpy as jnp
from jax import lax
from jax.experimental import pallas as pl
from jax.experimental.pallas import tpu as pltpu


def _lstm_fc_kernel(x_ref, w_ih_ref, w_hh_ref, b_ref, w_fc_ref, b_fc_ref, out_ref,
                    *, T, B_pad, H):
    """Whole LSTM sequence + final Linear + Sigmoid in one kernel invocation.

    x_ref:    (T*B_pad, I)  time-major, sublane-padded batch blocks
    w_ih_ref: (I, G4P)      [Wi|Wf|Wg|Wo]^T gate-packed lanes (4H, lane-padded)
    w_hh_ref: (H, G4P)      hidden->gates, gate-packed lanes
    b_ref:    (1, G4P)      b_ih + b_hh, zero in padded lanes
    w_fc_ref: (H, OP)       fc weights, lane-dense output (cols >= O are zero)
    b_fc_ref: (1, OP)
    out_ref:  (B_pad, OP)   sigmoid(fc(h_T)); wrapper slices [:B, :O]
    """
    # One fused MXU issue for the input projections of ALL timesteps (sits off
    # the serial critical path); bias added once to the fused result.
    xg_all = (jnp.dot(x_ref[...], w_ih_ref[...], preferred_element_type=jnp.float32)
              + b_ref[...])                                          # (T*B_pad, G4P)

    # h_0 = c_0 = 0 (PyTorch default); carried purely in vregs, width H only.
    h = jnp.zeros((B_pad, H), jnp.float32)
    c = jnp.zeros((B_pad, H), jnp.float32)

    # Trace-time unrolled recurrence (T is static & small).  W_hh is indexed
    # from its VMEM ref inside the dot each step so it is never a long-lived
    # hoisted value (keeps vreg pressure low; VMEM loads are ~free).
    for t in range(T):
        gates = (xg_all[t * B_pad:(t + 1) * B_pad, :]
                 + jnp.dot(h, w_hh_ref[...],
                           preferred_element_type=jnp.float32))      # (B_pad, G4P)
        # Gate-packed lanes: one sigmoid push covers i, f and o; one tanh for g
        # and one tanh for c -> 3 EUP pushes/step (vs 5 on 4x-padded lanes).
        sig = jax.nn.sigmoid(gates)
        i_g = sig[:, 0 * H:1 * H]
        f_g = sig[:, 1 * H:2 * H]
        o_g = sig[:, 3 * H:4 * H]
        g_g = jnp.tanh(gates[:, 2 * H:3 * H])
        c = f_g * c + i_g * g_g
        h = o_g * jnp.tanh(c)

    # fc(h_T) + sigmoid; lane-dense (B_pad, OP) store -> unmasked vst.
    logits = (jnp.dot(h, w_fc_ref[...], preferred_element_type=jnp.float32)
              + b_fc_ref[...])
    out_ref[...] = jax.nn.sigmoid(logits).astype(out_ref.dtype)


def prepare_params(params):
    """One-time repack of PyTorch-layout LSTM/Linear params into kernel layout.

    Call once and reuse across forward calls (hoisted out of the per-call path).
    """
    w_ih, w_hh = params["weight_ih"], params["weight_hh"]     # (4H, I), (4H, H)
    b = params["bias_ih"] + params["bias_hh"]                 # (4H,)
    w_fc, b_fc = params["fc_weight"], params["fc_bias"]       # (O, H), (O,)
    f32 = jnp.float32

    H = w_hh.shape[1]
    O = w_fc.shape[0]
    G4 = 4 * H
    G4P = pl.cdiv(G4, 128) * 128        # gate-packed lane width (== 128 for H=32)
    OP = pl.cdiv(O, 128) * 128          # lane-dense fc output width

    w_ih_p = jnp.pad(w_ih.T.astype(f32), ((0, 0), (0, G4P - G4)))            # (I, G4P)
    w_hh_p = jnp.pad(w_hh.T.astype(f32), ((0, 0), (0, G4P - G4)))            # (H, G4P)
    b_p = jnp.pad(b.astype(f32).reshape(1, G4), ((0, 0), (0, G4P - G4)))     # (1, G4P)
    w_fc_p = jnp.pad(w_fc.T.astype(f32), ((0, 0), (0, OP - O)))              # (H, OP)
    b_fc_p = jnp.pad(b_fc.astype(f32).reshape(1, O), ((0, 0), (0, OP - O)))  # (1, OP)

    return dict(w_ih=w_ih_p, w_hh=w_hh_p, bias=b_p, w_fc=w_fc_p, fc_bias=b_fc_p,
                hidden_size=int(H), output_size=int(O))


def rnn_spam_classifier_forward(x, packed):
    """x: (B, T, input_size) float32 (PyTorch batch_first). packed: prepare_params()."""
    H, O = packed["hidden_size"], packed["output_size"]
    B, T, I = x.shape
    B_pad = pl.cdiv(B, 8) * 8

    # (B, T, I) -> (T, B_pad, I) -> (T*B_pad, I): per-step blocks are contiguous,
    # sublane-aligned slices of the fused input-projection result.
    x_f = jnp.pad(jnp.transpose(x.astype(jnp.float32), (1, 0, 2)),
                  ((0, 0), (0, B_pad - B), (0, 0))).reshape(T * B_pad, I)

    kernel = functools.partial(_lstm_fc_kernel, T=T, B_pad=B_pad, H=H)
    vmem = pl.BlockSpec(memory_space=pltpu.MemorySpace.VMEM)
    OP = packed["w_fc"].shape[1]

    out = pl.pallas_call(
        kernel,
        out_shape=jax.ShapeDtypeStruct((B_pad, OP), jnp.float32),
        in_specs=[vmem] * 6,
        out_specs=vmem,
    )(x_f, packed["w_ih"], packed["w_hh"], packed["bias"],
      packed["w_fc"], packed["fc_bias"])
    return out[:B, :O]


def init_params(key, input_size, hidden_size, output_size):
    """Deterministic synthetic parameters matching nn.LSTM / nn.Linear shapes."""
    ks = jax.random.split(key, 6)
    scale = 1.0 / jnp.sqrt(hidden_size)
    u = lambda k, shape: jax.random.uniform(k, shape, jnp.float32, -scale, scale)
    return {
        "weight_ih": u(ks[0], (4 * hidden_size, input_size)),   # W_{ii,if,ig,io}
        "weight_hh": u(ks[1], (4 * hidden_size, hidden_size)),  # W_{hi,hf,hg,ho}
        "bias_ih":   u(ks[2], (4 * hidden_size,)),
        "bias_hh":   u(ks[3], (4 * hidden_size,)),
        "fc_weight": u(ks[4], (output_size, hidden_size)),
        "fc_bias":   u(ks[5], (output_size,)),
    }


def reference_forward(x, params):
    """Pure-JAX reference (PyTorch LSTM semantics) for a sanity check."""
    w_ih, w_hh = params["weight_ih"], params["weight_hh"]
    b = params["bias_ih"] + params["bias_hh"]
    H = w_hh.shape[1]
    B = x.shape[0]

    def cell(carry, x_t):
        h, c = carry
        gates = x_t @ w_ih.T + h @ w_hh.T + b
        i = jax.nn.sigmoid(gates[:, 0 * H:1 * H])
        f = jax.nn.sigmoid(gates[:, 1 * H:2 * H])
        g = jnp.tanh(gates[:, 2 * H:3 * H])
        o = jax.nn.sigmoid(gates[:, 3 * H:4 * H])
        c = f * c + i * g
        h = o * jnp.tanh(c)
        return (h, c), None

    h0 = jnp.zeros((B, H), jnp.float32)
    (h_last, _), _ = lax.scan(cell, (h0, h0), jnp.transpose(x, (1, 0, 2)))
    return jax.nn.sigmoid(h_last @ params["fc_weight"].T + params["fc_bias"])


if __name__ == "__main__":
    B, T, INPUT_SIZE, HIDDEN_SIZE, OUTPUT_SIZE = 2, 8, 16, 32, 1

    key = jax.random.PRNGKey(0)
    k_x, k_p = jax.random.split(key)
    x = jax.random.normal(k_x, (B, T, INPUT_SIZE), dtype=jnp.float32)
    params = init_params(k_p, INPUT_SIZE, HIDDEN_SIZE, OUTPUT_SIZE)

    packed = prepare_params(params)          # one-time repack, reused per call
    out = rnn_spam_classifier_forward(x, packed)
    out = jax.block_until_ready(out)

    ref = reference_forward(x, params)
    assert out.shape == (B, OUTPUT_SIZE)
    assert jnp.allclose(out, ref, atol=1e-5, rtol=1e-5), (out, ref)

    print("KERNEL_OK")
</pallas_src>

<mosaic_0001>
module attributes {stable_mosaic.version = 11 : i64} {
  func.func @_lstm_fc_kernel(%arg0: memref<64x16xf32, #tpu.memory_space<vmem>>, %arg1: memref<16x128xf32, #tpu.memory_space<vmem>>, %arg2: memref<32x128xf32, #tpu.memory_space<vmem>>, %arg3: memref<1x128xf32, #tpu.memory_space<vmem>>, %arg4: memref<32x128xf32, #tpu.memory_space<vmem>>, %arg5: memref<1x128xf32, #tpu.memory_space<vmem>>, %arg6: memref<8x128xf32, #tpu.memory_space<vmem>>) attributes {dimension_semantics = [], scalar_prefetch = 0 : i64, scratch_operands = 0 : i64, tpu.core_type = #tpu.core_type<tc>} {
    %c0 = arith.constant 0 : index
    %c0_0 = arith.constant 0 : index
    %0 = vector.load %arg0[%c0, %c0_0] : memref<64x16xf32, #tpu.memory_space<vmem>>, vector<64x16xf32>
    %c0_1 = arith.constant 0 : index
    %c0_2 = arith.constant 0 : index
    %1 = vector.load %arg1[%c0_1, %c0_2] : memref<16x128xf32, #tpu.memory_space<vmem>>, vector<16x128xf32>
    %cst = arith.constant dense<0.000000e+00> : vector<64x128xf32>
    %2 = tpu.matmul %0, %1, %cst {dimension_numbers = #tpu.dot_dimension_numbers<[1], [0], [0], [1], [0, 0, 1, 1], [], []>} : vector<64x16xf32>, vector<16x128xf32>, vector<64x128xf32> -> vector<64x128xf32>
    %c0_3 = arith.constant 0 : index
    %c0_4 = arith.constant 0 : index
    %3 = vector.load %arg3[%c0_3, %c0_4] : memref<1x128xf32, #tpu.memory_space<vmem>>, vector<1x128xf32>
    %4 = vector.broadcast %3 : vector<1x128xf32> to vector<64x128xf32>
    %5 = arith.addf %2, %4 : vector<64x128xf32>
    %cst_5 = arith.constant 0.000000e+00 : f32
    %6 = vector.broadcast %cst_5 : f32 to vector<8x32xf32>
    %cst_6 = arith.constant 0.000000e+00 : f32
    %7 = vector.broadcast %cst_6 : f32 to vector<8x32xf32>
    %8 = vector.extract_strided_slice %5 {offsets = [0, 0], sizes = [8, 128], strides = [1, 1]} : vector<64x128xf32> to vector<8x128xf32>
    %c0_7 = arith.constant 0 : index
    %c0_8 = arith.constant 0 : index
    %9 = vector.load %arg2[%c0_7, %c0_8] : memref<32x128xf32, #tpu.memory_space<vmem>>, vector<32x128xf32>
    %cst_9 = arith.constant dense<0.000000e+00> : vector<8x128xf32>
    %10 = tpu.matmul %6, %9, %cst_9 {dimension_numbers = #tpu.dot_dimension_numbers<[1], [0], [0], [1], [0, 0, 1, 1], [], []>} : vector<8x32xf32>, vector<32x128xf32>, vector<8x128xf32> -> vector<8x128xf32>
    %11 = arith.addf %8, %10 : vector<8x128xf32>
    %12 = arith.negf %11 : vector<8x128xf32>
    %13 = math.exp %12 : vector<8x128xf32>
    %cst_10 = arith.constant 1.000000e+00 : f32
    %14 = vector.broadcast %cst_10 : f32 to vector<8x128xf32>
    %15 = arith.addf %14, %13 : vector<8x128xf32>
    %16 = arith.divf %14, %15 : vector<8x128xf32>
    %17 = vector.extract_strided_slice %16 {offsets = [0, 0], sizes = [8, 32], strides = [1, 1]} : vector<8x128xf32> to vector<8x32xf32>
    %18 = vector.extract_strided_slice %16 {offsets = [0, 32], sizes = [8, 32], strides = [1, 1]} : vector<8x128xf32> to vector<8x32xf32>
    %19 = vector.extract_strided_slice %16 {offsets = [0, 96], sizes = [8, 32], strides = [1, 1]} : vector<8x128xf32> to vector<8x32xf32>
    %20 = vector.extract_strided_slice %11 {offsets = [0, 64], sizes = [8, 32], strides = [1, 1]} : vector<8x128xf32> to vector<8x32xf32>
    %21 = math.tanh %20 : vector<8x32xf32>
    %22 = arith.mulf %18, %7 : vector<8x32xf32>
    %23 = arith.mulf %17, %21 : vector<8x32xf32>
    %24 = arith.addf %22, %23 : vector<8x32xf32>
    %25 = math.tanh %24 : vector<8x32xf32>
    %26 = arith.mulf %19, %25 : vector<8x32xf32>
    %27 = vector.extract_strided_slice %5 {offsets = [8, 0], sizes = [8, 128], strides = [1, 1]} : vector<64x128xf32> to vector<8x128xf32>
    %c0_11 = arith.constant 0 : index
    %c0_12 = arith.constant 0 : index
    %28 = vector.load %arg2[%c0_11, %c0_12] : memref<32x128xf32, #tpu.memory_space<vmem>>, vector<32x128xf32>
    %cst_13 = arith.constant dense<0.000000e+00> : vector<8x128xf32>
    %29 = tpu.matmul %26, %28, %cst_13 {dimension_numbers = #tpu.dot_dimension_numbers<[1], [0], [0], [1], [0, 0, 1, 1], [], []>} : vector<8x32xf32>, vector<32x128xf32>, vector<8x128xf32> -> vector<8x128xf32>
    %30 = arith.addf %27, %29 : vector<8x128xf32>
    %31 = arith.negf %30 : vector<8x128xf32>
    %32 = math.exp %31 : vector<8x128xf32>
    %cst_14 = arith.constant 1.000000e+00 : f32
    %33 = vector.broadcast %cst_14 : f32 to vector<8x128xf32>
    %34 = arith.addf %33, %32 : vector<8x128xf32>
    %35 = arith.divf %33, %34 : vector<8x128xf32>
    %36 = vector.extract_strided_slice %35 {offsets = [0, 0], sizes = [8, 32], strides = [1, 1]} : vector<8x128xf32> to vector<8x32xf32>
    %37 = vector.extract_strided_slice %35 {offsets = [0, 32], sizes = [8, 32], strides = [1, 1]} : vector<8x128xf32> to vector<8x32xf32>
    %38 = vector.extract_strided_slice %35 {offsets = [0, 96], sizes = [8, 32], strides = [1, 1]} : vector<8x128xf32> to vector<8x32xf32>
    %39 = vector.extract_strided_slice %30 {offsets = [0, 64], sizes = [8, 32], strides = [1, 1]} : vector<8x128xf32> to vector<8x32xf32>
    %40 = math.tanh %39 : vector<8x32xf32>
    %41 = arith.mulf %37, %24 : vector<8x32xf32>
    %42 = arith.mulf %36, %40 : vector<8x32xf32>
    %43 = arith.addf %41, %42 : vector<8x32xf32>
    %44 = math.tanh %43 : vector<8x32xf32>
    %45 = arith.mulf %38, %44 : vector<8x32xf32>
    %46 = vector.extract_strided_slice %5 {offsets = [16, 0], sizes = [8, 128], strides = [1, 1]} : vector<64x128xf32> to vector<8x128xf32>
    %c0_15 = arith.constant 0 : index
    %c0_16 = arith.constant 0 : index
    %47 = vector.load %arg2[%c0_15, %c0_16] : memref<32x128xf32, #tpu.memory_space<vmem>>, vector<32x128xf32>
    %cst_17 = arith.constant dense<0.000000e+00> : vector<8x128xf32>
    %48 = tpu.matmul %45, %47, %cst_17 {dimension_numbers = #tpu.dot_dimension_numbers<[1], [0], [0], [1], [0, 0, 1, 1], [], []>} : vector<8x32xf32>, vector<32x128xf32>, vector<8x128xf32> -> vector<8x128xf32>
    %49 = arith.addf %46, %48 : vector<8x128xf32>
    %50 = arith.negf %49 : vector<8x128xf32>
    %51 = math.exp %50 : vector<8x128xf32>
    %cst_18 = arith.constant 1.000000e+00 : f32
    %52 = vector.broadcast %cst_18 : f32 to vector<8x128xf32>
    %53 = arith.addf %52, %51 : vector<8x128xf32>
    %54 = arith.divf %52, %53 : vector<8x128xf32>
    %55 = vector.extract_strided_slice %54 {offsets = [0, 0], sizes = [8, 32], strides = [1, 1]} : vector<8x128xf32> to vector<8x32xf32>
    %56 = vector.extract_strided_slice %54 {offsets = [0, 32], sizes = [8, 32], strides = [1, 1]} : vector<8x128xf32> to vector<8x32xf32>
    %57 = vector.extract_strided_slice %54 {offsets = [0, 96], sizes = [8, 32], strides = [1, 1]} : vector<8x128xf32> to vector<8x32xf32>
    %58 = vector.extract_strided_slice %49 {offsets = [0, 64], sizes = [8, 32], strides = [1, 1]} : vector<8x128xf32> to vector<8x32xf32>
    %59 = math.tanh %58 : vector<8x32xf32>
    %60 = arith.mulf %56, %43 : vector<8x32xf32>
    %61 = arith.mulf %55, %59 : vector<8x32xf32>
    %62 = arith.addf %60, %61 : vector<8x32xf32>
    %63 = math.tanh %62 : vector<8x32xf32>
    %64 = arith.mulf %57, %63 : vector<8x32xf32>
    %65 = vector.extract_strided_slice %5 {offsets = [24, 0], sizes = [8, 128], strides = [1, 1]} : vector<64x128xf32> to vector<8x128xf32>
    %c0_19 = arith.constant 0 : index
    %c0_20 = arith.constant 0 : index
    %66 = vector.load %arg2[%c0_19, %c0_20] : memref<32x128xf32, #tpu.memory_space<vmem>>, vector<32x128xf32>
    %cst_21 = arith.constant dense<0.000000e+00> : vector<8x128xf32>
    %67 = tpu.matmul %64, %66, %cst_21 {dimension_numbers = #tpu.dot_dimension_numbers<[1], [0], [0], [1], [0, 0, 1, 1], [], []>} : vector<8x32xf32>, vector<32x128xf32>, vector<8x128xf32> -> vector<8x128xf32>
    %68 = arith.addf %65, %67 : vector<8x128xf32>
    %69 = arith.negf %68 : vector<8x128xf32>
    %70 = math.exp %69 : vector<8x128xf32>
    %cst_22 = arith.constant 1.000000e+00 : f32
    %71 = vector.broadcast %cst_22 : f32 to vector<8x128xf32>
    %72 = arith.addf %71, %70 : vector<8x128xf32>
    %73 = arith.divf %71, %72 : vector<8x128xf32>
    %74 = vector.extract_strided_slice %73 {offsets = [0, 0], sizes = [8, 32], strides = [1, 1]} : vector<8x128xf32> to vector<8x32xf32>
    %75 = vector.extract_strided_slice %73 {offsets = [0, 32], sizes = [8, 32], strides = [1, 1]} : vector<8x128xf32> to vector<8x32xf32>
    %76 = vector.extract_strided_slice %73 {offsets = [0, 96], sizes = [8, 32], strides = [1, 1]} : vector<8x128xf32> to vector<8x32xf32>
    %77 = vector.extract_strided_slice %68 {offsets = [0, 64], sizes = [8, 32], strides = [1, 1]} : vector<8x128xf32> to vector<8x32xf32>
    %78 = math.tanh %77 : vector<8x32xf32>
    %79 = arith.mulf %75, %62 : vector<8x32xf32>
    %80 = arith.mulf %74, %78 : vector<8x32xf32>
    %81 = arith.addf %79, %80 : vector<8x32xf32>
    %82 = math.tanh %81 : vector<8x32xf32>
    %83 = arith.mulf %76, %82 : vector<8x32xf32>
    %84 = vector.extract_strided_slice %5 {offsets = [32, 0], sizes = [8, 128], strides = [1, 1]} : vector<64x128xf32> to vector<8x128xf32>
    %c0_23 = arith.constant 0 : index
    %c0_24 = arith.constant 0 : index
    %85 = vector.load %arg2[%c0_23, %c0_24] : memref<32x128xf32, #tpu.memory_space<vmem>>, vector<32x128xf32>
    %cst_25 = arith.constant dense<0.000000e+00> : vector<8x128xf32>
    %86 = tpu.matmul %83, %85, %cst_25 {dimension_numbers = #tpu.dot_dimension_numbers<[1], [0], [0], [1], [0, 0, 1, 1], [], []>} : vector<8x32xf32>, vector<32x128xf32>, vector<8x128xf32> -> vector<8x128xf32>
    %87 = arith.addf %84, %86 : vector<8x128xf32>
    %88 = arith.negf %87 : vector<8x128xf32>
    %89 = math.exp %88 : vector<8x128xf32>
    %cst_26 = arith.constant 1.000000e+00 : f32
    %90 = vector.broadcast %cst_26 : f32 to vector<8x128xf32>
    %91 = arith.addf %90, %89 : vector<8x128xf32>
    %92 = arith.divf %90, %91 : vector<8x128xf32>
    %93 = vector.extract_strided_slice %92 {offsets = [0, 0], sizes = [8, 32], strides = [1, 1]} : vector<8x128xf32> to vector<8x32xf32>
    %94 = vector.extract_strided_slice %92 {offsets = [0, 32], sizes = [8, 32], strides = [1, 1]} : vector<8x128xf32> to vector<8x32xf32>
    %95 = vector.extract_strided_slice %92 {offsets = [0, 96], sizes = [8, 32], strides = [1, 1]} : vector<8x128xf32> to vector<8x32xf32>
    %96 = vector.extract_strided_slice %87 {offsets = [0, 64], sizes = [8, 32], strides = [1, 1]} : vector<8x128xf32> to vector<8x32xf32>
    %97 = math.tanh %96 : vector<8x32xf32>
    %98 = arith.mulf %94, %81 : vector<8x32xf32>
    %99 = arith.mulf %93, %97 : vector<8x32xf32>
    %100 = arith.addf %98, %99 : vector<8x32xf32>
    %101 = math.tanh %100 : vector<8x32xf32>
    %102 = arith.mulf %95, %101 : vector<8x32xf32>
    %103 = vector.extract_strided_slice %5 {offsets = [40, 0], sizes = [8, 128], strides = [1, 1]} : vector<64x128xf32> to vector<8x128xf32>
    %c0_27 = arith.constant 0 : index
    %c0_28 = arith.constant 0 : index
    %104 = vector.load %arg2[%c0_27, %c0_28] : memref<32x128xf32, #tpu.memory_space<vmem>>, vector<32x128xf32>
    %cst_29 = arith.constant dense<0.000000e+00> : vector<8x128xf32>
    %105 = tpu.matmul %102, %104, %cst_29 {dimension_numbers = #tpu.dot_dimension_numbers<[1], [0], [0], [1], [0, 0, 1, 1], [], []>} : vector<8x32xf32>, vector<32x128xf32>, vector<8x128xf32> -> vector<8x128xf32>
    %106 = arith.addf %103, %105 : vector<8x128xf32>
    %107 = arith.negf %106 : vector<8x128xf32>
    %108 = math.exp %107 : vector<8x128xf32>
    %cst_30 = arith.constant 1.000000e+00 : f32
    %109 = vector.broadcast %cst_30 : f32 to vector<8x128xf32>
    %110 = arith.addf %109, %108 : vector<8x128xf32>
    %111 = arith.divf %109, %110 : vector<8x128xf32>
    %112 = vector.extract_strided_slice %111 {offsets = [0, 0], sizes = [8, 32], strides = [1, 1]} : vector<8x128xf32> to vector<8x32xf32>
    %113 = vector.extract_strided_slice %111 {offsets = [0, 32], sizes = [8, 32], strides = [1, 1]} : vector<8x128xf32> to vector<8x32xf32>
    %114 = vector.extract_strided_slice %111 {offsets = [0, 96], sizes = [8, 32], strides = [1, 1]} : vector<8x128xf32> to vector<8x32xf32>
    %115 = vector.extract_strided_slice %106 {offsets = [0, 64], sizes = [8, 32], strides = [1, 1]} : vector<8x128xf32> to vector<8x32xf32>
    %116 = math.tanh %115 : vector<8x32xf32>
    %117 = arith.mulf %113, %100 : vector<8x32xf32>
    %118 = arith.mulf %112, %116 : vector<8x32xf32>
    %119 = arith.addf %117, %118 : vector<8x32xf32>
    %120 = math.tanh %119 : vector<8x32xf32>
    %121 = arith.mulf %114, %120 : vector<8x32xf32>
    %122 = vector.extract_strided_slice %5 {offsets = [48, 0], sizes = [8, 128], strides = [1, 1]} : vector<64x128xf32> to vector<8x128xf32>
    %c0_31 = arith.constant 0 : index
    %c0_32 = arith.constant 0 : index
    %123 = vector.load %arg2[%c0_31, %c0_32] : memref<32x128xf32, #tpu.memory_space<vmem>>, vector<32x128xf32>
    %cst_33 = arith.constant dense<0.000000e+00> : vector<8x128xf32>
    %124 = tpu.matmul %121, %123, %cst_33 {dimension_numbers = #tpu.dot_dimension_numbers<[1], [0], [0], [1], [0, 0, 1, 1], [], []>} : vector<8x32xf32>, vector<32x128xf32>, vector<8x128xf32> -> vector<8x128xf32>
    %125 = arith.addf %122, %124 : vector<8x128xf32>
    %126 = arith.negf %125 : vector<8x128xf32>
    %127 = math.exp %126 : vector<8x128xf32>
    %cst_34 = arith.constant 1.000000e+00 : f32
    %128 = vector.broadcast %cst_34 : f32 to vector<8x128xf32>
    %129 = arith.addf %128, %127 : vector<8x128xf32>
    %130 = arith.divf %128, %129 : vector<8x128xf32>
    %131 = vector.extract_strided_slice %130 {offsets = [0, 0], sizes = [8, 32], strides = [1, 1]} : vector<8x128xf32> to vector<8x32xf32>
    %132 = vector.extract_strided_slice %130 {offsets = [0, 32], sizes = [8, 32], strides = [1, 1]} : vector<8x128xf32> to vector<8x32xf32>
    %133 = vector.extract_strided_slice %130 {offsets = [0, 96], sizes = [8, 32], strides = [1, 1]} : vector<8x128xf32> to vector<8x32xf32>
    %134 = vector.extract_strided_slice %125 {offsets = [0, 64], sizes = [8, 32], strides = [1, 1]} : vector<8x128xf32> to vector<8x32xf32>
    %135 = math.tanh %134 : vector<8x32xf32>
    %136 = arith.mulf %132, %119 : vector<8x32xf32>
    %137 = arith.mulf %131, %135 : vector<8x32xf32>
    %138 = arith.addf %136, %137 : vector<8x32xf32>
    %139 = math.tanh %138 : vector<8x32xf32>
    %140 = arith.mulf %133, %139 : vector<8x32xf32>
    %141 = vector.extract_strided_slice %5 {offsets = [56, 0], sizes = [8, 128], strides = [1, 1]} : vector<64x128xf32> to vector<8x128xf32>
    %c0_35 = arith.constant 0 : index
    %c0_36 = arith.constant 0 : index
    %142 = vector.load %arg2[%c0_35, %c0_36] : memref<32x128xf32, #tpu.memory_space<vmem>>, vector<32x128xf32>
    %cst_37 = arith.constant dense<0.000000e+00> : vector<8x128xf32>
    %143 = tpu.matmul %140, %142, %cst_37 {dimension_numbers = #tpu.dot_dimension_numbers<[1], [0], [0], [1], [0, 0, 1, 1], [], []>} : vector<8x32xf32>, vector<32x128xf32>, vector<8x128xf32> -> vector<8x128xf32>
    %144 = arith.addf %141, %143 : vector<8x128xf32>
    %145 = arith.negf %144 : vector<8x128xf32>
    %146 = math.exp %145 : vector<8x128xf32>
    %cst_38 = arith.constant 1.000000e+00 : f32
    %147 = vector.broadcast %cst_38 : f32 to vector<8x128xf32>
    %148 = arith.addf %147, %146 : vector<8x128xf32>
    %149 = arith.divf %147, %148 : vector<8x128xf32>
    %150 = vector.extract_strided_slice %149 {offsets = [0, 0], sizes = [8, 32], strides = [1, 1]} : vector<8x128xf32> to vector<8x32xf32>
    %151 = vector.extract_strided_slice %149 {offsets = [0, 32], sizes = [8, 32], strides = [1, 1]} : vector<8x128xf32> to vector<8x32xf32>
    %152 = vector.extract_strided_slice %149 {offsets = [0, 96], sizes = [8, 32], strides = [1, 1]} : vector<8x128xf32> to vector<8x32xf32>
    %153 = vector.extract_strided_slice %144 {offsets = [0, 64], sizes = [8, 32], strides = [1, 1]} : vector<8x128xf32> to vector<8x32xf32>
    %154 = math.tanh %153 : vector<8x32xf32>
    %155 = arith.mulf %151, %138 : vector<8x32xf32>
    %156 = arith.mulf %150, %154 : vector<8x32xf32>
    %157 = arith.addf %155, %156 : vector<8x32xf32>
    %158 = math.tanh %157 : vector<8x32xf32>
    %159 = arith.mulf %152, %158 : vector<8x32xf32>
    %c0_39 = arith.constant 0 : index
    %c0_40 = arith.constant 0 : index
    %160 = vector.load %arg4[%c0_39, %c0_40] : memref<32x128xf32, #tpu.memory_space<vmem>>, vector<32x128xf32>
    %cst_41 = arith.constant dense<0.000000e+00> : vector<8x128xf32>
    %161 = tpu.matmul %159, %160, %cst_41 {dimension_numbers = #tpu.dot_dimension_numbers<[1], [0], [0], [1], [0, 0, 1, 1], [], []>} : vector<8x32xf32>, vector<32x128xf32>, vector<8x128xf32> -> vector<8x128xf32>
    %c0_42 = arith.constant 0 : index
    %c0_43 = arith.constant 0 : index
    %162 = vector.load %arg5[%c0_42, %c0_43] : memref<1x128xf32, #tpu.memory_space<vmem>>, vector<1x128xf32>
    %163 = vector.broadcast %162 : vector<1x128xf32> to vector<8x128xf32>
    %164 = arith.addf %161, %163 : vector<8x128xf32>
    %165 = arith.negf %164 : vector<8x128xf32>
    %166 = math.exp %165 : vector<8x128xf32>
    %cst_44 = arith.constant 1.000000e+00 : f32
    %167 = vector.broadcast %cst_44 : f32 to vector<8x128xf32>
    %168 = arith.addf %167, %166 : vector<8x128xf32>
    %169 = arith.divf %167, %168 : vector<8x128xf32>
    %c0_45 = arith.constant 0 : index
    %c0_46 = arith.constant 0 : index
    %170 = vector.load %arg6[%c0_45, %c0_46] : memref<8x128xf32, #tpu.memory_space<vmem>>, vector<8x128xf32>
    tpu.vector_store %arg6[%c0_45, %c0_46], %169 {strides = array<i32>} : memref<8x128xf32, #tpu.memory_space<vmem>>, vector<8x128xf32>,
    return
  }
}

</mosaic_0001>

<bundles_post_ra>
// kernel: tpu_custom_call.1
= control target key start
LH: loop header
LB: loop body
LE: loop exit
PB: predicated region body
PF: predicated region fallthrough
CT: control target
= control target key end

     0   :  { %v1373_v3 = vmov 0.0   ;;  %vm41_vm0 = vcmask 130048   ;;  %s1641_s0 = inlined_call_operand.vmem [shape: f32[64,16], index: 0, kind: input, shape index: {}]   ;;  %s1642_s1 = inlined_call_operand.vmem [shape: f32[16,128], index: 1, kind: input, shape index: {}]   ;;  %s1643_s2 = inlined_call_operand.vmem [shape: f32[32,128], index: 2, kind: input, shape index: {}]   ;;  %s1644_s3 = inlined_call_operand.vmem [shape: f32[1,128], index: 3, kind: input, shape index: {}]   ;;  %s1645_s4 = inlined_call_operand.vmem [shape: f32[32,128], index: 4, kind: input, shape index: {}]   ;;  %s1646_s5 = inlined_call_operand.vmem [shape: f32[1,128], index: 5, kind: input, shape index: {}]   ;;  %s1647_s6 = inlined_call_operand.hbm [shape: f32[8,128], index: 6, kind: output, shape index: {}]  }
   0x1   :  { %v33_v0 = vld [vmem:[%s1642_s1 + $0x8] sm:$0xff]  ;;  %v1419_v1 = vld [vmem:[%s1643_s2 + $0x18] sm:$0xff]  ;;  %v32_v2 = vld [vmem:[%s1642_s1] sm:$0xff]  ;;  %1179 = vmatprep.subr.mxu1 %v1373_v3 }
   0x2   :  { %1163 = vmatprep.subr.mxu0 %v33_v0  ;;  %v24_v4 = vld [vmem:[%s1641_s0] sm:$0xff]  ;;  %1180 = vmatpush3.msra.mxu1 %v1419_v1  ;;  %v1432_v5 = vld [vmem:[%s1643_s2 + $0x10] sm:$0xff]  ;;  %v25_v6 = vld [vmem:[%s1641_s0 + $0x8] sm:$0xff] }
   0x3   :  { %1164 = vmatpush3.msra.mxu0 %v33_v0 }
   0x4   :  { %11 = vsyncpa [#allocation3], 0  ;;  %1165 = vmatprep.subr.mxu0 %v32_v2  ;;  %1181 = vmatprep.subr.mxu1 %v1373_v3  ;;  %v1442_v7 = vld [vmem:[%s1643_s2 + $0x8] sm:$0xff]  ;;  %v1450_v8 = vld [vmem:[%s1643_s2] sm:$0xff]  ;;  %vm1374_vm1 = vmmov 0   ;;  %s1375_s13 = smov 64  }
   0x5   :  { %1166 = vmatpush3.msra.mxu0 %v32_v2  ;;  %1167 = vmatprep.mubr.msk.f32.mxu0 %vm41_vm0, %v24_v4  ;;  %v1481_v10 = vld [vmem:[%s1644_s3] ss:$0 sm:$0xff]  ;;  %s1376_s3 = smov 32   ;;  %vm175_vm2 = vcmask 261120   ;;  %v26_v44 = vld [vmem:[%s1641_s0 + $0x10] sm:$0xff]  ;;  %v27_v45 = vld [vmem:[%s1641_s0 + $0x18] sm:$0xff] }
   0x6   :  { %1182 = vmatpush3.msra.mxu1 %v1432_v5  ;;  %1168 = vmatmul.mubr.msk.f32.vlgmr.msra.gmra.mxu0 %vm41_vm0, %v25_v6  ;;  %v28_v46 = vld [vmem:[%s1641_s0 + $0x20] sm:$0xff]  ;;  %v29_v47 = vld [vmem:[%s1641_s0 + $0x28] sm:$0xff]  ;;  %v30_v48 = vld [vmem:[%s1641_s0 + $0x30] sm:$0xff] }
   0x7   :  { %1183 = vmatprep.subr.mxu1 %v1373_v3  ;;  %1187 = vmatprep.mubr.msk.f32.mxu1 %vm1374_vm1, %v1373_v3  ;;  %v31_v49 = vld [vmem:[%s1641_s0 + $0x38] sm:$0xff] }
   0x8   :  { %1184 = vmatpush3.msra.mxu1 %v1442_v7  ;;  %1201 = vmatprep.subr.mxu0 %v1373_v3 }
   0x9   :  { %1185 = vmatprep.subr.mxu1 %v1373_v3  ;;  %1202 = vmatpush3.msra.mxu0 %v1419_v1 }
   0xa   :  { %1186 = vmatpush3.msra.mxu1 %v1450_v8  ;;  %1203 = vmatprep.subr.mxu0 %v1373_v3 }
   0xb   :  { %1188 = vmatmul.mubr.f32.vlgmr.msra.gmra.mxu1 %v1373_v3  ;;  %1190 = vmatprep.subr.mxu1 %v1373_v3 }
   0xc   :  { %1191 = vmatpush3.msra.mxu1 %v1419_v1  ;;  %1198 = vmatprep.mubr.msk.f32.mxu1 %vm1374_vm1, %v1373_v3 }
   0xd   :  { %1192 = vmatprep.subr.mxu1 %v1373_v3  ;;  %1204 = vmatpush3.msra.mxu0 %v1432_v5 }
   0xe   :  { %1193 = vmatpush3.msra.mxu1 %v1432_v5  ;;  %1205 = vmatprep.subr.mxu0 %v1373_v3 }
   0xf   :  { %1194 = vmatprep.subr.mxu1 %v1373_v3  ;;  %1206 = vmatpush3.msra.mxu0 %v1442_v7 }
  0x10   :  { %1195 = vmatpush3.msra.mxu1 %v1442_v7  ;;  %1207 = vmatprep.subr.mxu0 %v1373_v3 }
  0x11   :  { %1196 = vmatprep.subr.mxu1 %v1373_v3  ;;  %1208 = vmatpush3.msra.mxu0 %v1450_v8 }
  0x12   :  { %1197 = vmatpush3.msra.mxu1 %v1450_v8  ;;  %1223 = vmatprep.subr.mxu0 %v1373_v3 }
  0x13   :  { %1212 = vmatprep.subr.mxu1 %v1373_v3  ;;  %1170 = vmatprep.mubr.msk.f32.mxu0 %vm41_vm0, %v26_v44 }
  0x14   :  { %1171 = vmatmul.mubr.msk.f32.gmra.mxu0 %vm41_vm0, %v27_v45 }
  0x15   :  { %1173 = vmatprep.mubr.msk.f32.mxu0 %vm41_vm0, %v28_v46 }
  0x18   :  { %1174 = vmatmul.mubr.msk.f32.gmra.mxu0 %vm41_vm0, %v29_v47 }
  0x19   :  { %1176 = vmatprep.mubr.msk.f32.mxu0 %vm41_vm0, %v30_v48 }
  0x1c   :  { %1177 = vmatmul.mubr.msk.f32.gmra.mxu0 %vm41_vm0, %v31_v49 }
  0x1d   :  { %1209 = vmatprep.mubr.msk.f32.mxu0 %vm1374_vm1, %v1373_v3 }
  0xc6   :  { %v1169_v9 = vpop.f32.mrf.mxu0 }
  0xc7   :  { %v138_v30 = vadd.f32 %v1169_v9, %v1481_v10 }
  0xc8   :  { %v132_v11 = vpop.f32.mrf.mxu0 }
  0xc9   :  { %v133_v12 = vadd.f32 %v1481_v10, %v132_v11 }
  0xcb   :  { %v245_v13 = vpop.f32.mrf.mxu1 }
  0xcc   :  { %v249_v14 = vadd.f32 %v245_v13, %v133_v12 }
  0xcd   :  { %v1189_v15 = vpop.f32.mrf.mxu1 }
  0xce   :  { %1283 = vtanh.f32 %v249_v14  ;;  %v1090_v17 = vmul.f32 -1.442695, %v249_v14 }
  0xd0   :  { %1285 = vpow2.f32 %v1090_v17 }
  0xd4   :  { %v1172_v54 = vpop.f32.mrf.mxu0 }
  0xd6   :  { %v142_v55 = vpop.f32.mrf.mxu0 }
  0xd7   :  { %v143_v60 = vadd.f32 %v1481_v10, %v142_v55 }
  0xd8   :  { %v1541_v56 = vpop.f32.mrf.mxu0 }
  0xda   :  { %v1543_v57 = vpop.f32.mrf.mxu0 }
  0xdb   :  { %v1284_v16 = vpop.eup %1283 }
  0xdc   :  { %259 = vrot.lane.b32.xlu0 %v1284_v16, %s1375_s13  ;;  %v1545_v58 = vpop.f32.mrf.mxu0 }
  0xdd   :  { %v1286_v18 = vpop.eup %1285 }
  0xde   :  { %v253_v19 = vadd.f32 1.0, %v1286_v18  ;;  %v1547_v59 = vpop.f32.mrf.mxu0 }
  0xe0   :  { %1287 = vrcp.f32 %v253_v19 }
  0xed   :  { %v1288_v20 = vpop.eup %1287 }
  0xee   :  { %v257_v23 = vmul.f32 0.0, %v1288_v20 }
 0x14e   :  { %v260_v21 = vpop.permute.xlu0 %259 }
 0x14f   :  { %v262_v22 = vmul.f32 %v1288_v20, %v260_v21 }
 0x151   :  { %264 = vrot.lane.b32.xlu0 %v262_v22, %s1376_s3 }
 0x1c3   :  { %v265_v24 = vpop.permute.xlu0 %264 }
 0x1c4   :  { %v267_v25 = vadd.f32 %v265_v24, %v257_v23 }
 0x1c6   :  { %1289 = vtanh.f32 %v267_v25 }
 0x1d3   :  { %v1290_v26 = vpop.eup %1289 }
 0x1d4   :  { %270 = vrot.lane.b32.xlu1 %v1290_v26, %s1375_s13 }
 0x246   :  { %v271_v27 = vpop.permute.xlu1 %270 }
 0x247   :  { %v273_v28 = vmul.f32 %v1288_v20, %v271_v27  ;;  %v148_v20 = vadd.f32 %v1172_v54, %v1481_v10 }
 0x249   :  { %275 = vrot.lane.b32.xlu1 %v273_v28, %s1376_s3 }
 0x2bb   :  { %v276_v29 = vpop.permute.xlu1 %275 }
 0x2bc   :  { %1199 = vmatmul.mubr.msk.f32.vlgmr.msra.gmra.mxu1 %vm175_vm2, %v276_v29 }
 0x2bd   :  { %1213 = vmatpush3.msra.mxu1 %v1419_v1  ;;  %1220 = vmatprep.mubr.msk.f32.mxu1 %vm1374_vm1, %v1373_v3 }
 0x2be   :  { %1214 = vmatprep.subr.mxu1 %v1373_v3 }
 0x2bf   :  { %1215 = vmatpush3.msra.mxu1 %v1432_v5 }
 0x2c0   :  { %1216 = vmatprep.subr.mxu1 %v1373_v3 }
 0x2c1   :  { %1217 = vmatpush3.msra.mxu1 %v1442_v7 }
 0x2c2   :  { %1218 = vmatprep.subr.mxu1 %v1373_v3 }
 0x2c3   :  { %1219 = vmatpush3.msra.mxu1 %v1450_v8 }
 0x2c4   :  { %1234 = vmatprep.subr.mxu1 %v1373_v3 }
 0x37c   :  { %v345_v31 = vpop.f32.mrf.mxu1 }
 0x37d   :  { %v349_v32 = vadd.f32 %v345_v31, %v138_v30 }
 0x37e   :  { %v1200_v33 = vpop.f32.mrf.mxu1 }
 0x37f   :  { %1291 = vtanh.f32 %v349_v32  ;;  %v1092_v35 = vmul.f32 -1.442695, %v349_v32 }
 0x381   :  { %1293 = vpow2.f32 %v1092_v35 }
 0x38c   :  { %v1292_v34 = vpop.eup %1291 }
 0x38d   :  { %359 = vrot.lane.b32.xlu0 %v1292_v34, %s1375_s13 }
 0x38e   :  { %v1294_v36 = vpop.eup %1293 }
 0x38f   :  { %v353_v37 = vadd.f32 1.0, %v1294_v36 }
 0x391   :  { %1295 = vrcp.f32 %v353_v37 }
 0x39e   :  { %v1296_v38 = vpop.eup %1295 }
 0x39f   :  { %v357_v41 = vmul.f32 %v1296_v38, %v267_v25 }
 0x3ff   :  { %v360_v39 = vpop.permute.xlu0 %359 }
 0x400   :  { %v362_v40 = vmul.f32 %v1296_v38, %v360_v39 }
 0x402   :  { %364 = vrot.lane.b32.xlu1 %v362_v40, %s1376_s3 }
 0x474   :  { %v365_v42 = vpop.permute.xlu1 %364 }
 0x475   :  { %v367_v43 = vadd.f32 %v365_v42, %v357_v41 }
 0x477   :  { %1297 = vtanh.f32 %v367_v43 }
 0x484   :  { %v1298_v50 = vpop.eup %1297 }
 0x485   :  { %370 = vrot.lane.b32.xlu0 %v1298_v50, %s1375_s13 }
 0x4f7   :  { %v371_v51 = vpop.permute.xlu0 %370 }
 0x4f8   :  { %v373_v52 = vmul.f32 %v1296_v38, %v371_v51  ;;  %v153_v38 = vadd.f32 %v1481_v10, %v1543_v57  ;;  %v158_v57 = vadd.f32 %v1541_v56, %v1481_v10 }
 0x4fa   :  { %375 = vrot.lane.b32.xlu1 %v373_v52, %s1376_s3 }
 0x56c   :  { %v376_v53 = vpop.permute.xlu1 %375 }
 0x56d   :  { %1210 = vmatmul.mubr.msk.f32.vlgmr.msra.gmra.mxu0 %vm175_vm2, %v376_v53 }
 0x56e   :  { %1224 = vmatpush3.msra.mxu0 %v1419_v1  ;;  %1231 = vmatprep.mubr.msk.f32.mxu0 %vm1374_vm1, %v1373_v3 }
 0x56f   :  { %1225 = vmatprep.subr.mxu0 %v1373_v3 }
 0x570   :  { %1226 = vmatpush3.msra.mxu0 %v1432_v5 }
 0x571   :  { %1227 = vmatprep.subr.mxu0 %v1373_v3 }
 0x572   :  { %1228 = vmatpush3.msra.mxu0 %v1442_v7 }
 0x573   :  { %1229 = vmatprep.subr.mxu0 %v1373_v3 }
 0x574   :  { %1230 = vmatpush3.msra.mxu0 %v1450_v8 }
 0x575   :  { %1245 = vmatprep.subr.mxu0 %v1373_v3 }
 0x62d   :  { %v445_v61 = vpop.f32.mrf.mxu0 }
 0x62e   :  { %v449_v62 = vadd.f32 %v445_v61, %v143_v60 }
 0x62f   :  { %v1211_v63 = vpop.f32.mrf.mxu0 }
 0x630   :  { %1299 = vtanh.f32 %v449_v62  ;;  %v1094_v2 = vmul.f32 -1.442695, %v449_v62 }
 0x632   :  { %1301 = vpow2.f32 %v1094_v2 }
 0x63d   :  { %v1300_v0 = vpop.eup %1299 }
 0x63e   :  { %459 = vrot.lane.b32.xlu0 %v1300_v0, %s1375_s13 }
 0x63f   :  { %v1302_v4 = vpop.eup %1301 }
 0x640   :  { %v453_v6 = vadd.f32 1.0, %v1302_v4 }
 0x642   :  { %1303 = vrcp.f32 %v453_v6 }
 0x64f   :  { %v1304_v9 = vpop.eup %1303 }
 0x650   :  { %v457_v13 = vmul.f32 %v1304_v9, %v367_v43 }
 0x6b0   :  { %v460_v11 = vpop.permute.xlu0 %459 }
 0x6b1   :  { %v462_v12 = vmul.f32 %v1304_v9, %v460_v11 }
 0x6b3   :  { %464 = vrot.lane.b32.xlu1 %v462_v12, %s1376_s3 }
 0x725   :  { %v465_v14 = vpop.permute.xlu1 %464 }
 0x726   :  { %v467_v15 = vadd.f32 %v465_v14, %v457_v13  ;;  %v163_v14 = vadd.f32 %v1481_v10, %v1547_v59 }
 0x728   :  { %1305 = vtanh.f32 %v467_v15 }
 0x735   :  { %v1306_v16 = vpop.eup %1305 }
 0x736   :  { %470 = vrot.lane.b32.xlu0 %v1306_v16, %s1375_s13 }
 0x7a8   :  { %v471_v17 = vpop.permute.xlu0 %470 }
 0x7a9   :  { %v473_v18 = vmul.f32 %v1304_v9, %v471_v17 }
 0x7ab   :  { %475 = vrot.lane.b32.xlu1 %v473_v18, %s1376_s3 }
 0x81d   :  { %v476_v19 = vpop.permute.xlu1 %475 }
 0x81e   :  { %1221 = vmatmul.mubr.msk.f32.vlgmr.msra.gmra.mxu1 %vm175_vm2, %v476_v19 }
 0x81f   :  { %1235 = vmatpush3.msra.mxu1 %v1419_v1  ;;  %1242 = vmatprep.mubr.msk.f32.mxu1 %vm1374_vm1, %v1373_v3 }
 0x820   :  { %1236 = vmatprep.subr.mxu1 %v1373_v3 }
 0x821   :  { %1237 = vmatpush3.msra.mxu1 %v1432_v5 }
 0x822   :  { %1238 = vmatprep.subr.mxu1 %v1373_v3 }
 0x823   :  { %1239 = vmatpush3.msra.mxu1 %v1442_v7 }
 0x824   :  { %1240 = vmatprep.subr.mxu1 %v1373_v3 }
 0x825   :  { %1241 = vmatpush3.msra.mxu1 %v1450_v8 }
 0x826   :  { %1256 = vmatprep.subr.mxu1 %v1373_v3 }
 0x8de   :  { %v545_v21 = vpop.f32.mrf.mxu1 }
 0x8df   :  { %v549_v22 = vadd.f32 %v545_v21, %v148_v20 }
 0x8e0   :  { %v1222_v23 = vpop.f32.mrf.mxu1 }
 0x8e1   :  { %1307 = vtanh.f32 %v549_v22  ;;  %v1096_v25 = vmul.f32 -1.442695, %v549_v22 }
 0x8e3   :  { %1309 = vpow2.f32 %v1096_v25 }
 0x8ee   :  { %v1308_v24 = vpop.eup %1307 }
 0x8ef   :  { %559 = vrot.lane.b32.xlu0 %v1308_v24, %s1375_s13 }
 0x8f0   :  { %v1310_v26 = vpop.eup %1309 }
 0x8f1   :  { %v553_v27 = vadd.f32 1.0, %v1310_v26 }
 0x8f3   :  { %1311 = vrcp.f32 %v553_v27 }
 0x900   :  { %v1312_v28 = vpop.eup %1311 }
 0x901   :  { %v557_v31 = vmul.f32 %v1312_v28, %v467_v15 }
 0x961   :  { %v560_v29 = vpop.permute.xlu0 %559 }
 0x962   :  { %v562_v30 = vmul.f32 %v1312_v28, %v560_v29 }
 0x964   :  { %564 = vrot.lane.b32.xlu1 %v562_v30, %s1376_s3 }
 0x9d6   :  { %v565_v32 = vpop.permute.xlu1 %564 }
 0x9d7   :  { %v567_v33 = vadd.f32 %v565_v32, %v557_v31  ;;  %v168_v31 = vadd.f32 %v1545_v58, %v1481_v10  ;;  %v977_v58 = vld [vmem:[%s1645_s4 + $0x18] sm:$0xff] }
 0x9d9   :  { %1313 = vtanh.f32 %v567_v33 }
 0x9e6   :  { %v1314_v34 = vpop.eup %1313 }
 0x9e7   :  { %570 = vrot.lane.b32.xlu0 %v1314_v34, %s1375_s13 }
 0xa59   :  { %v571_v35 = vpop.permute.xlu0 %570 }
 0xa5a   :  { %v573_v36 = vmul.f32 %v1312_v28, %v571_v35 }
 0xa5c   :  { %575 = vrot.lane.b32.xlu1 %v573_v36, %s1376_s3 }
 0xace   :  { %v576_v37 = vpop.permute.xlu1 %575 }
 0xacf   :  { %1232 = vmatmul.mubr.msk.f32.vlgmr.msra.gmra.mxu0 %vm175_vm2, %v576_v37 }
 0xad0   :  { %1246 = vmatpush3.msra.mxu0 %v1419_v1  ;;  %1253 = vmatprep.mubr.msk.f32.mxu0 %vm1374_vm1, %v1373_v3 }
 0xad1   :  { %1247 = vmatprep.subr.mxu0 %v1373_v3 }
 0xad2   :  { %1248 = vmatpush3.msra.mxu0 %v1432_v5 }
 0xad3   :  { %1249 = vmatprep.subr.mxu0 %v1373_v3 }
 0xad4   :  { %1250 = vmatpush3.msra.mxu0 %v1442_v7 }
 0xad5   :  { %1251 = vmatprep.subr.mxu0 %v1373_v3 }
 0xad6   :  { %1252 = vmatpush3.msra.mxu0 %v1450_v8 }
 0xad7   :  { %1267 = vmatprep.subr.mxu0 %v1373_v3 }
 0xb8f   :  { %v645_v39 = vpop.f32.mrf.mxu0 }
 0xb90   :  { %v649_v40 = vadd.f32 %v645_v39, %v153_v38 }
 0xb91   :  { %v1233_v41 = vpop.f32.mrf.mxu0 }
 0xb92   :  { %1315 = vtanh.f32 %v649_v40  ;;  %v1098_v43 = vmul.f32 -1.442695, %v649_v40 }
 0xb94   :  { %1317 = vpow2.f32 %v1098_v43 }
 0xb9f   :  { %v1316_v42 = vpop.eup %1315 }
 0xba0   :  { %659 = vrot.lane.b32.xlu0 %v1316_v42, %s1375_s13 }
 0xba1   :  { %v1318_v44 = vpop.eup %1317 }
 0xba2   :  { %v653_v45 = vadd.f32 1.0, %v1318_v44  ;;  %v976_v44 = vld [vmem:[%s1645_s4 + $0x10] sm:$0xff] }
 0xba4   :  { %1319 = vrcp.f32 %v653_v45  ;;  %v975_v45 = vld [vmem:[%s1645_s4 + $0x8] sm:$0xff] }
 0xbb1   :  { %v1320_v46 = vpop.eup %1319 }
 0xbb2   :  { %v657_v49 = vmul.f32 %v1320_v46, %v567_v33 }
 0xc12   :  { %v660_v47 = vpop.permute.xlu0 %659 }
 0xc13   :  { %v662_v48 = vmul.f32 %v1320_v46, %v660_v47 }
 0xc15   :  { %664 = vrot.lane.b32.xlu1 %v662_v48, %s1376_s3 }
 0xc87   :  { %v665_v50 = vpop.permute.xlu1 %664 }
 0xc88   :  { %v667_v51 = vadd.f32 %v665_v50, %v657_v49 }
 0xc8a   :  { %1321 = vtanh.f32 %v667_v51 }
 0xc97   :  { %v1322_v52 = vpop.eup %1321 }
 0xc98   :  { %670 = vrot.lane.b32.xlu0 %v1322_v52, %s1375_s13 }
 0xd0a   :  { %v671_v53 = vpop.permute.xlu0 %670 }
 0xd0b   :  { %v673_v54 = vmul.f32 %v1320_v46, %v671_v53  ;;  %v974_v46 = vld [vmem:[%s1645_s4] sm:$0xff]  ;;  %s1377_s4 = smov [#allocation2]  }
 0xd0c   :  { %s1073_s10 = sshll.u32 %s1377_s4, 4  ;;  %s1074_s10 = int_to_ptr.vmem [resolvable:$true] %s1073_s10 }
 0xd0d   :  { %675 = vrot.lane.b32.xlu1 %v673_v54, %s1376_s3  ;;  %s1351_s11 = scalar_lea.vmem %s1074_s10, 128  ;;  %p1356_p1 = scmp.lt.s32.totalorder %s1074_s10, %s1074_s10 }
 0xd0e   :  { %p1352_p0 = scmp.ne.s32.totalorder %s1074_s10, %s1351_s11  ;;  %p1357_p2 = scmp.lt.s32.totalorder %s1351_s11, %s1351_s11 }
 0xd10   :  { %p1358_p3 = por %p1357_p2, %p1356_p1 }
 0xd12   :  { %p1359_p4 = pnand %p1358_p3, %p1352_p0 }
 0xd7f   :  { %v676_v55 = vpop.permute.xlu1 %675 }
 0xd80   :  { %1243 = vmatmul.mubr.msk.f32.vlgmr.msra.gmra.mxu1 %vm175_vm2, %v676_v55 }
 0xd81   :  { %1257 = vmatpush3.msra.mxu1 %v1419_v1  ;;  %1264 = vmatprep.mubr.msk.f32.mxu1 %vm1374_vm1, %v1373_v3 }
 0xd82   :  { %1258 = vmatprep.subr.mxu1 %v1373_v3 }
 0xd83   :  { %1259 = vmatpush3.msra.mxu1 %v1432_v5 }
 0xd84   :  { %1260 = vmatprep.subr.mxu1 %v1373_v3 }
 0xd85   :  { %1261 = vmatpush3.msra.mxu1 %v1442_v7 }
 0xd86   :  { %1262 = vmatprep.subr.mxu1 %v1373_v3 }
 0xd87   :  { %1263 = vmatpush3.msra.mxu1 %v1450_v8 }
 0xe40   :  { %v745_v60 = vpop.f32.mrf.mxu1 }
 0xe41   :  { %v749_v1 = vadd.f32 %v745_v60, %v158_v57 }
 0xe42   :  { %v1244_v61 = vpop.f32.mrf.mxu1 }
 0xe43   :  { %1323 = vtanh.f32 %v749_v1  ;;  %v1100_v63 = vmul.f32 -1.442695, %v749_v1 }
 0xe45   :  { %1325 = vpow2.f32 %v1100_v63 }
 0xe50   :  { %v1324_v62 = vpop.eup %1323 }
 0xe51   :  { %759 = vrot.lane.b32.xlu0 %v1324_v62, %s1375_s13 }
 0xe52   :  { %v1326_v5 = vpop.eup %1325 }
 0xe53   :  { %v753_v0 = vadd.f32 1.0, %v1326_v5 }
 0xe55   :  { %1327 = vrcp.f32 %v753_v0 }
 0xe62   :  { %v1328_v7 = vpop.eup %1327 }
 0xe63   :  { %v757_v8 = vmul.f32 %v1328_v7, %v667_v51  ;;  %v1105_v51 = vld [vmem:[%s1646_s5] ss:$0 sm:$0xff] }
 0xec3   :  { %v760_v2 = vpop.permute.xlu0 %759 }
 0xec4   :  { %v762_v4 = vmul.f32 %v1328_v7, %v760_v2 }
 0xec6   :  { %764 = vrot.lane.b32.xlu1 %v762_v4, %s1376_s3 }
 0xf38   :  { %v765_v6 = vpop.permute.xlu1 %764 }
 0xf39   :  { %v767_v56 = vadd.f32 %v765_v6, %v757_v8 }
 0xf3b   :  { %1329 = vtanh.f32 %v767_v56 }
 0xf48   :  { %v1330_v9 = vpop.eup %1329 }
 0xf49   :  { %770 = vrot.lane.b32.xlu0 %v1330_v9, %s1375_s13 }
 0xfbb   :  { %v771_v11 = vpop.permute.xlu0 %770 }
 0xfbc   :  { %v773_v12 = vmul.f32 %v1328_v7, %v771_v11 }
 0xfbe   :  { %775 = vrot.lane.b32.xlu1 %v773_v12, %s1376_s3 }
0x1030   :  { %v776_v13 = vpop.permute.xlu1 %775 }
0x1031   :  { %1254 = vmatmul.mubr.msk.f32.vlgmr.msra.gmra.mxu0 %vm175_vm2, %v776_v13 }
0x1032   :  { %1275 = vmatprep.mubr.msk.f32.mxu0 %vm1374_vm1, %v1373_v3  ;;  %1268 = vmatpush3.msra.mxu0 %v977_v58 }
0x1033   :  { %1269 = vmatprep.subr.mxu0 %v1373_v3 }
0x1034   :  { %1270 = vmatpush3.msra.mxu0 %v976_v44 }
0x1035   :  { %1271 = vmatprep.subr.mxu0 %v1373_v3 }
0x1036   :  { %1272 = vmatpush3.msra.mxu0 %v975_v45 }
0x1037   :  { %1273 = vmatprep.subr.mxu0 %v1373_v3 }
0x1038   :  { %1274 = vmatpush3.msra.mxu0 %v974_v46 }
0x10f1   :  { %v845_v15 = vpop.f32.mrf.mxu0 }
0x10f2   :  { %v849_v16 = vadd.f32 %v845_v15, %v163_v14 }
0x10f3   :  { %v1255_v17 = vpop.f32.mrf.mxu0 }
0x10f4   :  { %1331 = vtanh.f32 %v849_v16  ;;  %v1102_v19 = vmul.f32 -1.442695, %v849_v16 }
0x10f6   :  { %1333 = vpow2.f32 %v1102_v19 }
0x1101   :  { %v1332_v18 = vpop.eup %1331 }
0x1102   :  { %859 = vrot.lane.b32.xlu0 %v1332_v18, %s1375_s13 }
0x1103   :  { %v1334_v20 = vpop.eup %1333 }
0x1104   :  { %v853_v21 = vadd.f32 1.0, %v1334_v20 }
0x1106   :  { %1335 = vrcp.f32 %v853_v21 }
0x1113   :  { %v1336_v22 = vpop.eup %1335 }
0x1114   :  { %v857_v25 = vmul.f32 %v1336_v22, %v767_v56 }
0x1174   :  { %v860_v23 = vpop.permute.xlu0 %859 }
0x1175   :  { %v862_v24 = vmul.f32 %v1336_v22, %v860_v23 }
0x1177   :  { %864 = vrot.lane.b32.xlu1 %v862_v24, %s1376_s3 }
0x11e9   :  { %v865_v26 = vpop.permute.xlu1 %864 }
0x11ea   :  { %v867_v59 = vadd.f32 %v865_v26, %v857_v25 }
0x11ec   :  { %1337 = vtanh.f32 %v867_v59 }
0x11f9   :  { %v1338_v27 = vpop.eup %1337 }
0x11fa   :  { %870 = vrot.lane.b32.xlu0 %v1338_v27, %s1375_s13 }
0x126c   :  { %v871_v28 = vpop.permute.xlu0 %870 }
0x126d   :  { %v873_v29 = vmul.f32 %v1336_v22, %v871_v28 }
0x126f   :  { %875 = vrot.lane.b32.xlu1 %v873_v29, %s1376_s3 }
0x12e1   :  { %v876_v30 = vpop.permute.xlu1 %875 }
0x12e2   :  { %1265 = vmatmul.mubr.msk.f32.vlgmr.msra.gmra.mxu1 %vm175_vm2, %v876_v30 }
0x13a2   :  { %v945_v32 = vpop.f32.mrf.mxu1 }
0x13a3   :  { %v949_v33 = vadd.f32 %v945_v32, %v168_v31 }
0x13a4   :  { %v1266_v34 = vpop.f32.mrf.mxu1 }
0x13a5   :  { %1339 = vtanh.f32 %v949_v33  ;;  %v1104_v36 = vmul.f32 -1.442695, %v949_v33 }
0x13a7   :  { %1341 = vpow2.f32 %v1104_v36 }
0x13b2   :  { %v1340_v35 = vpop.eup %1339 }
0x13b3   :  { %959 = vrot.lane.b32.xlu0 %v1340_v35, %s1375_s13 }
0x13b4   :  { %v1342_v37 = vpop.eup %1341 }
0x13b5   :  { %v953_v38 = vadd.f32 1.0, %v1342_v37 }
0x13b7   :  { %1343 = vrcp.f32 %v953_v38 }
0x13c4   :  { %v1344_v39 = vpop.eup %1343 }
0x13c5   :  { %v957_v42 = vmul.f32 %v1344_v39, %v867_v59 }
0x1425   :  { %v960_v40 = vpop.permute.xlu0 %959 }
0x1426   :  { %v962_v41 = vmul.f32 %v1344_v39, %v960_v40 }
0x1428   :  { %964 = vrot.lane.b32.xlu1 %v962_v41, %s1376_s3 }
0x149a   :  { %v965_v43 = vpop.permute.xlu1 %964 }
0x149b   :  { %v967_v10 = vadd.f32 %v965_v43, %v957_v42 }
0x149d   :  { %1345 = vtanh.f32 %v967_v10 }
0x14aa   :  { %v1346_v47 = vpop.eup %1345 }
0x14ab   :  { %970 = vrot.lane.b32.xlu0 %v1346_v47, %s1375_s13 }
0x151d   :  { %v971_v48 = vpop.permute.xlu0 %970 }
0x151e   :  { %v973_v49 = vmul.f32 %v1344_v39, %v971_v48 }
0x1520   :  { %986 = vrot.lane.b32.xlu1 %v973_v49, %s1376_s3 }
0x1592   :  { %v987_v50 = vpop.permute.xlu1 %986 }
0x1593   :  { %1276 = vmatmul.mubr.msk.f32.vlgmr.msra.gmra.mxu0 %vm175_vm2, %v987_v50 }
0x1653   :  { %v1056_v52 = vpop.f32.mrf.mxu0 }
0x1654   :  { %v1057_v53 = vadd.f32 %v1105_v51, %v1056_v52 }
0x1655   :  { %v1277_v54 = vpop.f32.mrf.mxu0 }
0x1656   :  { %v1107_v55 = vmul.f32 -1.442695, %v1057_v53 }
0x1658   :  { %1347 = vpow2.f32 %v1107_v55 }
0x1665   :  { %v1348_v3 = vpop.eup %1347 }
0x1666   :  { %v1063_v57 = vadd.f32 1.0, %v1348_v3 }
0x1668   :  { %1349 = vrcp.f32 %v1063_v57 }
0x1675   :  { %v1350_v60 = vpop.eup %1349 }
0x1676   :  { %1066 = vst [vmem:[#allocation2] sm:$0xff] %v1350_v60 }
0x1677   :  { %1362 = shalt.err (!%p1359_p4)
}
0x1678   :  { %1076 = dma.vmem_to_hbm [thread:$0]  %s1074_s10, 128, %s1647_s6, [#allocation3]  }
0x1679   :  { %1371 = dma.done.wait [#allocation3], 128  }
0x167a   :  { %1372 = vsyncadd [#allocation3], 4294967168 }
0x167b   :  { %1080 = vsyncpa [#allocation3], 1 }

</bundles_post_ra>
